<compile_context>
chip_gen: v6e
topology: v6e:2x2x1
jax: 0.10.0
libtpu: 0.0.40
codegen_flags: <defaults>
</compile_context>

<pallas_src>
import functools

import jax
import jax.numpy as jnp
from jax.experimental import pallas as pl
from jax.experimental.pallas import tpu as pltpu

_LANE = 128


def _bce_dice_kernel(wbd_ref, pred_ref, target_ref, out_ref,
                     bce_acc, inter_acc, pt_acc,
                     *, batch, s_pack, tn, lw, n_packed, total_elems):
    step = pl.program_id(0)
    n_steps = pl.num_programs(0)

    @pl.when(step == 0)
    def _init():
        bce_acc[...] = jnp.zeros_like(bce_acc)
        inter_acc[...] = jnp.zeros_like(inter_acc)
        pt_acc[...] = jnp.zeros_like(pt_acc)

    # Cast per tile (inputs arrive in native dtype; no wrapper upcast pass).
    p = pred_ref[...].astype(jnp.float32)
    t = target_ref[...].astype(jnp.float32)

    # Mask the ragged tail block (padded lanes contribute exactly zero).
    if n_packed % tn != 0:
        col = step * tn + jax.lax.broadcasted_iota(jnp.int32, p.shape, 1)
        valid = col < n_packed
        p = jnp.where(valid, p, 0.0)
        t = jnp.where(valid, t, 0.0)

    # BCE elementwise term, clamped at -100 like torch.nn.BCELoss.
    # (log(1-p) kept for PyTorch-faithful semantics and guaranteed lowering.)
    log_p = jnp.maximum(jnp.log(p), -100.0)
    log_1mp = jnp.maximum(jnp.log(1.0 - p), -100.0)
    bce_elem = -(t * log_p + (1.0 - t) * log_1mp)

    def lane_fold(x):
        # (BP, TN) -> (BP, LW) via static 128-lane slices + VALU adds only.
        if tn == lw:
            return x
        acc = x[:, 0:lw]
        for j in range(1, tn // lw):
            acc = acc + x[:, j * lw:(j + 1) * lw]
        return acc

    bce_acc[...] += lane_fold(bce_elem)
    inter_acc[...] += lane_fold(p * t)
    pt_acc[...] += lane_fold(p + t)

    @pl.when(step == n_steps - 1)
    def _finalize():
        wb = wbd_ref[0]
        wd = wbd_ref[1]
        smooth = jnp.float32(1.0)

        bce_loss = jnp.sum(bce_acc[...]) / jnp.float32(total_elems)

        if s_pack == 1:
            inter_b = jnp.sum(inter_acc[...], axis=1, keepdims=True)   # (B, 1)
            pt_b = jnp.sum(pt_acc[...], axis=1, keepdims=True)         # (B, 1)
            dice_scores = (2.0 * inter_b + smooth) / (pt_b + smooth)
            dice_sum = jnp.sum(dice_scores)
        else:
            # Packed rows b*s_pack .. (b+1)*s_pack-1 belong to batch row b.
            bp = batch * s_pack
            row_i = jax.lax.broadcasted_iota(jnp.int32, (bp, 1), 0)
            dice_sum = jnp.float32(0.0)
            for b in range(batch):  # static, finalize-only
                m = jnp.logical_and(row_i >= b * s_pack,
                                    row_i < (b + 1) * s_pack).astype(jnp.float32)
                i_b = jnp.sum(inter_acc[...] * m)
                pt_b = jnp.sum(pt_acc[...] * m)
                dice_sum = dice_sum + (2.0 * i_b + smooth) / (pt_b + smooth)

        dice_loss = 1.0 - dice_sum / jnp.float32(batch)
        out_ref[0, 0] = wd * dice_loss + wb * bce_loss


def _choose_pack(b, n):
    """Split factor S so that (B*S) rows give >=8 sublanes and S divides N."""
    if b >= 8 or n <= 1:
        return 1
    want = -(-8 // b)  # ceil(8 / b)
    for s in range(want, min(n, want * 16) + 1):
        if n % s == 0:
            return s
    return 1


def _choose_tn(bp, n_packed, in_itemsize, max_tn=None):
    """Lane-tile size: large for pipelining, bounded for VMEM (2 in x 2 bufs)."""
    budget = 8 * 1024 * 1024
    per_col = bp * in_itemsize * 4  # 2 inputs x 2 pipeline buffers
    tn = max(budget // per_col, _LANE)
    tn = min(tn, 16384)
    if max_tn is not None:
        tn = min(tn, max_tn)
    tn = max((tn // _LANE) * _LANE, _LANE)
    if n_packed <= tn:
        return int(n_packed)       # single full-row block (full-dim rule)
    return int(tn)                 # multiple of 128


def bce_dice_loss(pred, target, wb=1.0, wd=1.0, _max_tn=None):
    """pred, target: (B, C, H, W); pred must be probabilities in (0, 1)."""
    assert pred.shape == target.shape
    b = pred.shape[0]
    n = 1
    for d in pred.shape[1:]:
        n *= d

    s_pack = _choose_pack(b, n)
    bp = b * s_pack
    n_packed = n // s_pack

    # Native dtype, contiguous reshape only (no f32 upcast in the wrapper).
    pred2d = pred.reshape(bp, n_packed)
    target2d = target.reshape(bp, n_packed)

    in_itemsize = max(jnp.dtype(pred.dtype).itemsize,
                      jnp.dtype(target.dtype).itemsize)
    tn = _choose_tn(bp, n_packed, in_itemsize, _max_tn)
    lw = _LANE if tn % _LANE == 0 else tn
    n_steps = pl.cdiv(n_packed, tn)

    wbd = jnp.asarray([wb, wd], dtype=jnp.float32)

    kernel = functools.partial(
        _bce_dice_kernel,
        batch=b, s_pack=s_pack, tn=tn, lw=lw,
        n_packed=n_packed, total_elems=b * n,
    )

    out = pl.pallas_call(
        kernel,
        out_shape=jax.ShapeDtypeStruct((1, 1), jnp.float32),
        grid=(n_steps,),
        in_specs=[
            pl.BlockSpec(memory_space=pltpu.MemorySpace.SMEM),     # wb, wd
            pl.BlockSpec((bp, tn), lambda i: (0, i)),              # pred tile
            pl.BlockSpec((bp, tn), lambda i: (0, i)),              # target tile
        ],
        out_specs=pl.BlockSpec(memory_space=pltpu.MemorySpace.SMEM),
        scratch_shapes=[
            pltpu.VMEM((bp, lw), jnp.float32),   # bce partial sums
            pltpu.VMEM((bp, lw), jnp.float32),   # intersection partial sums
            pltpu.VMEM((bp, lw), jnp.float32),   # pred+target partial sums
        ],
        compiler_params=pltpu.CompilerParams(
            dimension_semantics=("arbitrary",),
            vmem_limit_bytes=32 * 1024 * 1024,
        ),
    )(wbd, pred2d, target2d)
    return out[0, 0]


def _reference(pred, target, wb=1.0, wd=1.0):
    b = pred.shape[0]
    p = pred.reshape(b, -1).astype(jnp.float32)
    t = target.reshape(b, -1).astype(jnp.float32)
    bce = jnp.mean(
        -(t * jnp.maximum(jnp.log(p), -100.0)
          + (1.0 - t) * jnp.maximum(jnp.log(1.0 - p), -100.0)))
    inter = jnp.sum(p * t, axis=1)
    dice_score = (2.0 * inter + 1.0) / (jnp.sum(p, axis=1) + jnp.sum(t, axis=1) + 1.0)
    dice = 1.0 - jnp.mean(dice_score)
    return wd * dice + wb * bce


if __name__ == "__main__":
    key = jax.random.PRNGKey(0)
    k1, k2, k3, k4 = jax.random.split(key, 4)

    # Test 1: B=2,C=4,H=16,W=16 — sublane packing (8x256), single grid step.
    B, C, H, W = 2, 4, 16, 16
    pred = jax.nn.sigmoid(jax.random.normal(k1, (B, C, H, W), dtype=jnp.float32))
    target = (jax.random.uniform(k2, (B, C, H, W)) > 0.5).astype(jnp.float32)
    loss = bce_dice_loss(pred, target, wb=1.0, wd=1.0)
    jax.block_until_ready(loss)
    ref = _reference(pred, target, 1.0, 1.0)
    assert jnp.allclose(loss, ref, atol=1e-5, rtol=1e-5), (loss, ref)

    # Test 2: multi-step grid with a ragged tail block (in-kernel mask) and
    # non-default loss weights (SMEM scalars).
    B2, C2, H2, W2 = 2, 3, 24, 20
    pred2 = jax.nn.sigmoid(jax.random.normal(k3, (B2, C2, H2, W2), dtype=jnp.float32))
    target2 = (jax.random.uniform(k4, (B2, C2, H2, W2)) > 0.5).astype(jnp.float32)
    loss2 = bce_dice_loss(pred2, target2, wb=0.7, wd=1.3, _max_tn=128)
    jax.block_until_ready(loss2)
    ref2 = _reference(pred2, target2, 0.7, 1.3)
    assert jnp.allclose(loss2, ref2, atol=1e-5, rtol=1e-5), (loss2, ref2)

    print("KERNEL_OK")
</pallas_src>

<mosaic_0001>
module attributes {stable_mosaic.version = 11 : i64} {
  func.func @_bce_dice_kernel(%arg0: i32, %arg1: memref<2xf32, #tpu.memory_space<smem>>, %arg2: memref<8x256xf32, #tpu.memory_space<vmem>>, %arg3: memref<8x256xf32, #tpu.memory_space<vmem>>, %arg4: memref<1x1xf32, #tpu.memory_space<smem>>, %arg5: memref<8x128xf32, #tpu.memory_space<vmem>>, %arg6: memref<8x128xf32, #tpu.memory_space<vmem>>, %arg7: memref<8x128xf32, #tpu.memory_space<vmem>>) attributes {dimension_semantics = [#tpu.dimension_semantics<arbitrary>], iteration_bounds = array<i64: 1>, scalar_prefetch = 0 : i64, scratch_operands = 3 : i64, tpu.core_type = #tpu.core_type<tc>, window_params = [{transform_indices = @transform_0, window_bounds = array<i64: 2>}, {transform_indices = @transform_1, window_bounds = array<i64: 8, 256>}, {transform_indices = @transform_2, window_bounds = array<i64: 8, 256>}, {transform_indices = @transform_3, window_bounds = array<i64: 1, 1>}]} {
    %c0_i32 = arith.constant 0 : i32
    %0 = arith.cmpi eq, %arg0, %c0_i32 : i32
    %1 = arith.extui %0 : i1 to i32
    %c0_i32_0 = arith.constant 0 : i32
    %2 = arith.cmpi ne, %1, %c0_i32_0 : i32
    scf.if %2 {
      %cst_22 = arith.constant 0.000000e+00 : f32
      %43 = vector.broadcast %cst_22 : f32 to vector<8x128xf32>
      %c0_23 = arith.constant 0 : index
      %c0_24 = arith.constant 0 : index
      %44 = vector.load %arg5[%c0_23, %c0_24] : memref<8x128xf32, #tpu.memory_space<vmem>>, vector<8x128xf32>
      tpu.vector_store %arg5[%c0_23, %c0_24], %43 {strides = array<i32>} : memref<8x128xf32, #tpu.memory_space<vmem>>, vector<8x128xf32>,
      %cst_25 = arith.constant 0.000000e+00 : f32
      %45 = vector.broadcast %cst_25 : f32 to vector<8x128xf32>
      %c0_26 = arith.constant 0 : index
      %c0_27 = arith.constant 0 : index
      %46 = vector.load %arg6[%c0_26, %c0_27] : memref<8x128xf32, #tpu.memory_space<vmem>>, vector<8x128xf32>
      tpu.vector_store %arg6[%c0_26, %c0_27], %45 {strides = array<i32>} : memref<8x128xf32, #tpu.memory_space<vmem>>, vector<8x128xf32>,
      %cst_28 = arith.constant 0.000000e+00 : f32
      %47 = vector.broadcast %cst_28 : f32 to vector<8x128xf32>
      %c0_29 = arith.constant 0 : index
      %c0_30 = arith.constant 0 : index
      %48 = vector.load %arg7[%c0_29, %c0_30] : memref<8x128xf32, #tpu.memory_space<vmem>>, vector<8x128xf32>
      tpu.vector_store %arg7[%c0_29, %c0_30], %47 {strides = array<i32>} : memref<8x128xf32, #tpu.memory_space<vmem>>, vector<8x128xf32>,
    } else {
    }
    %c0 = arith.constant 0 : index
    %c0_1 = arith.constant 0 : index
    %3 = vector.load %arg2[%c0, %c0_1] : memref<8x256xf32, #tpu.memory_space<vmem>>, vector<8x256xf32>
    %c0_2 = arith.constant 0 : index
    %c0_3 = arith.constant 0 : index
    %4 = vector.load %arg3[%c0_2, %c0_3] : memref<8x256xf32, #tpu.memory_space<vmem>>, vector<8x256xf32>
    %5 = math.log %3 : vector<8x256xf32>
    %cst = arith.constant -1.000000e+02 : f32
    %6 = vector.broadcast %cst : f32 to vector<8x256xf32>
    %7 = arith.maximumf %5, %6 : vector<8x256xf32>
    %cst_4 = arith.constant 1.000000e+00 : f32
    %8 = vector.broadcast %cst_4 : f32 to vector<8x256xf32>
    %9 = arith.subf %8, %3 : vector<8x256xf32>
    %10 = math.log %9 : vector<8x256xf32>
    %cst_5 = arith.constant -1.000000e+02 : f32
    %11 = vector.broadcast %cst_5 : f32 to vector<8x256xf32>
    %12 = arith.maximumf %10, %11 : vector<8x256xf32>
    %13 = arith.mulf %4, %7 : vector<8x256xf32>
    %cst_6 = arith.constant 1.000000e+00 : f32
    %14 = vector.broadcast %cst_6 : f32 to vector<8x256xf32>
    %15 = arith.subf %14, %4 : vector<8x256xf32>
    %16 = arith.mulf %15, %12 : vector<8x256xf32>
    %17 = arith.addf %13, %16 : vector<8x256xf32>
    %cst_7 = arith.constant 0.000000e+00 : f32
    %18 = vector.broadcast %cst_7 : f32 to vector<8x256xf32>
    %19 = arith.subf %18, %17 : vector<8x256xf32>
    %c0_8 = arith.constant 0 : index
    %c0_9 = arith.constant 0 : index
    %20 = vector.load %arg5[%c0_8, %c0_9] : memref<8x128xf32, #tpu.memory_space<vmem>>, vector<8x128xf32>
    %21 = vector.extract_strided_slice %19 {offsets = [0, 0], sizes = [8, 128], strides = [1, 1]} : vector<8x256xf32> to vector<8x128xf32>
    %22 = vector.extract_strided_slice %19 {offsets = [0, 128], sizes = [8, 128], strides = [1, 1]} : vector<8x256xf32> to vector<8x128xf32>
    %23 = arith.addf %21, %22 : vector<8x128xf32>
    %24 = arith.addf %20, %23 : vector<8x128xf32>
    %c0_10 = arith.constant 0 : index
    %c0_11 = arith.constant 0 : index
    %25 = vector.load %arg5[%c0_10, %c0_11] : memref<8x128xf32, #tpu.memory_space<vmem>>, vector<8x128xf32>
    tpu.vector_store %arg5[%c0_10, %c0_11], %24 {strides = array<i32>} : memref<8x128xf32, #tpu.memory_space<vmem>>, vector<8x128xf32>,
    %c0_12 = arith.constant 0 : index
    %c0_13 = arith.constant 0 : index
    %26 = vector.load %arg6[%c0_12, %c0_13] : memref<8x128xf32, #tpu.memory_space<vmem>>, vector<8x128xf32>
    %27 = arith.mulf %3, %4 : vector<8x256xf32>
    %28 = vector.extract_strided_slice %27 {offsets = [0, 0], sizes = [8, 128], strides = [1, 1]} : vector<8x256xf32> to vector<8x128xf32>
    %29 = vector.extract_strided_slice %27 {offsets = [0, 128], sizes = [8, 128], strides = [1, 1]} : vector<8x256xf32> to vector<8x128xf32>
    %30 = arith.addf %28, %29 : vector<8x128xf32>
    %31 = arith.addf %26, %30 : vector<8x128xf32>
    %c0_14 = arith.constant 0 : index
    %c0_15 = arith.constant 0 : index
    %32 = vector.load %arg6[%c0_14, %c0_15] : memref<8x128xf32, #tpu.memory_space<vmem>>, vector<8x128xf32>
    tpu.vector_store %arg6[%c0_14, %c0_15], %31 {strides = array<i32>} : memref<8x128xf32, #tpu.memory_space<vmem>>, vector<8x128xf32>,
    %c0_16 = arith.constant 0 : index
    %c0_17 = arith.constant 0 : index
    %33 = vector.load %arg7[%c0_16, %c0_17] : memref<8x128xf32, #tpu.memory_space<vmem>>, vector<8x128xf32>
    %34 = arith.addf %3, %4 : vector<8x256xf32>
    %35 = vector.extract_strided_slice %34 {offsets = [0, 0], sizes = [8, 128], strides = [1, 1]} : vector<8x256xf32> to vector<8x128xf32>
    %36 = vector.extract_strided_slice %34 {offsets = [0, 128], sizes = [8, 128], strides = [1, 1]} : vector<8x256xf32> to vector<8x128xf32>
    %37 = arith.addf %35, %36 : vector<8x128xf32>
    %38 = arith.addf %33, %37 : vector<8x128xf32>
    %c0_18 = arith.constant 0 : index
    %c0_19 = arith.constant 0 : index
    %39 = vector.load %arg7[%c0_18, %c0_19] : memref<8x128xf32, #tpu.memory_space<vmem>>, vector<8x128xf32>
    tpu.vector_store %arg7[%c0_18, %c0_19], %38 {strides = array<i32>} : memref<8x128xf32, #tpu.memory_space<vmem>>, vector<8x128xf32>,
    %c0_i32_20 = arith.constant 0 : i32
    %40 = arith.cmpi eq, %arg0, %c0_i32_20 : i32
    %41 = arith.extui %40 : i1 to i32
    %c0_i32_21 = arith.constant 0 : i32
    %42 = arith.cmpi ne, %41, %c0_i32_21 : i32
    scf.if %42 {
      %c0_22 = arith.constant 0 : index
      %43 = memref.load %arg1[%c0_22] : memref<2xf32, #tpu.memory_space<smem>>
      %c1 = arith.constant 1 : index
      %44 = memref.load %arg1[%c1] : memref<2xf32, #tpu.memory_space<smem>>
      %c0_23 = arith.constant 0 : index
      %c0_24 = arith.constant 0 : index
      %45 = vector.load %arg5[%c0_23, %c0_24] : memref<8x128xf32, #tpu.memory_space<vmem>>, vector<8x128xf32>
      %46 = vector.shape_cast %45 : vector<8x128xf32> to vector<1x8x128xf32>
      %cst_25 = arith.constant dense<0.000000e+00> : vector<1xf32>
      %47 = vector.multi_reduction <add>, %46, %cst_25 [1, 2] : vector<1x8x128xf32> to vector<1xf32>
      %48 = vector.shape_cast %47 : vector<1xf32> to vector<1x1x1xf32>
      %49 = vector.extract %48[0, 0, 0] : f32 from vector<1x1x1xf32>
      %cst_26 = arith.constant 2.048000e+03 : f32
      %50 = arith.divf %49, %cst_26 : f32
      %51 = tpu.iota {dimensions = array<i32: 0>} : vector<8x1xi32>
      %c0_i32_27 = arith.constant 0 : i32
      %52 = vector.broadcast %c0_i32_27 : i32 to vector<8x1xi32>
      %53 = arith.cmpi sge, %51, %52 : vector<8x1xi32>
      %c4_i32 = arith.constant 4 : i32
      %54 = vector.broadcast %c4_i32 : i32 to vector<8x1xi32>
      %55 = arith.cmpi slt, %51, %54 : vector<8x1xi32>
      %56 = arith.andi %53, %55 : vector<8x1xi1>
      %57 = arith.extui %56 : vector<8x1xi1> to vector<8x1xi32>
      %58 = arith.sitofp %57 : vector<8x1xi32> to vector<8x1xf32>
      %c0_28 = arith.constant 0 : index
      %c0_29 = arith.constant 0 : index
      %59 = vector.load %arg6[%c0_28, %c0_29] : memref<8x128xf32, #tpu.memory_space<vmem>>, vector<8x128xf32>
      %60 = vector.broadcast %58 : vector<8x1xf32> to vector<8x128xf32>
      %61 = arith.mulf %59, %60 : vector<8x128xf32>
      %62 = vector.shape_cast %61 : vector<8x128xf32> to vector<1x8x128xf32>
      %cst_30 = arith.constant dense<0.000000e+00> : vector<1xf32>
      %63 = vector.multi_reduction <add>, %62, %cst_30 [1, 2] : vector<1x8x128xf32> to vector<1xf32>
      %64 = vector.shape_cast %63 : vector<1xf32> to vector<1x1x1xf32>
      %65 = vector.extract %64[0, 0, 0] : f32 from vector<1x1x1xf32>
      %c0_31 = arith.constant 0 : index
      %c0_32 = arith.constant 0 : index
      %66 = vector.load %arg7[%c0_31, %c0_32] : memref<8x128xf32, #tpu.memory_space<vmem>>, vector<8x128xf32>
      %67 = vector.broadcast %58 : vector<8x1xf32> to vector<8x128xf32>
      %68 = arith.mulf %66, %67 : vector<8x128xf32>
      %69 = vector.shape_cast %68 : vector<8x128xf32> to vector<1x8x128xf32>
      %cst_33 = arith.constant dense<0.000000e+00> : vector<1xf32>
      %70 = vector.multi_reduction <add>, %69, %cst_33 [1, 2] : vector<1x8x128xf32> to vector<1xf32>
      %71 = vector.shape_cast %70 : vector<1xf32> to vector<1x1x1xf32>
      %72 = vector.extract %71[0, 0, 0] : f32 from vector<1x1x1xf32>
      %cst_34 = arith.constant 2.000000e+00 : f32
      %73 = arith.mulf %cst_34, %65 : f32
      %cst_35 = arith.constant 1.000000e+00 : f32
      %74 = arith.addf %73, %cst_35 : f32
      %cst_36 = arith.constant 1.000000e+00 : f32
      %75 = arith.addf %72, %cst_36 : f32
      %76 = arith.divf %74, %75 : f32
      %cst_37 = arith.constant 0.000000e+00 : f32
      %77 = arith.addf %cst_37, %76 : f32
      %c4_i32_38 = arith.constant 4 : i32
      %78 = vector.broadcast %c4_i32_38 : i32 to vector<8x1xi32>
      %79 = arith.cmpi sge, %51, %78 : vector<8x1xi32>
      %c8_i32 = arith.constant 8 : i32
      %80 = vector.broadcast %c8_i32 : i32 to vector<8x1xi32>
      %81 = arith.cmpi slt, %51, %80 : vector<8x1xi32>
      %82 = arith.andi %79, %81 : vector<8x1xi1>
      %83 = arith.extui %82 : vector<8x1xi1> to vector<8x1xi32>
      %84 = arith.sitofp %83 : vector<8x1xi32> to vector<8x1xf32>
      %c0_39 = arith.constant 0 : index
      %c0_40 = arith.constant 0 : index
      %85 = vector.load %arg6[%c0_39, %c0_40] : memref<8x128xf32, #tpu.memory_space<vmem>>, vector<8x128xf32>
      %86 = vector.broadcast %84 : vector<8x1xf32> to vector<8x128xf32>
      %87 = arith.mulf %85, %86 : vector<8x128xf32>
      %88 = vector.shape_cast %87 : vector<8x128xf32> to vector<1x8x128xf32>
      %cst_41 = arith.constant dense<0.000000e+00> : vector<1xf32>
      %89 = vector.multi_reduction <add>, %88, %cst_41 [1, 2] : vector<1x8x128xf32> to vector<1xf32>
      %90 = vector.shape_cast %89 : vector<1xf32> to vector<1x1x1xf32>
      %91 = vector.extract %90[0, 0, 0] : f32 from vector<1x1x1xf32>
      %c0_42 = arith.constant 0 : index
      %c0_43 = arith.constant 0 : index
      %92 = vector.load %arg7[%c0_42, %c0_43] : memref<8x128xf32, #tpu.memory_space<vmem>>, vector<8x128xf32>
      %93 = vector.broadcast %84 : vector<8x1xf32> to vector<8x128xf32>
      %94 = arith.mulf %92, %93 : vector<8x128xf32>
      %95 = vector.shape_cast %94 : vector<8x128xf32> to vector<1x8x128xf32>
      %cst_44 = arith.constant dense<0.000000e+00> : vector<1xf32>
      %96 = vector.multi_reduction <add>, %95, %cst_44 [1, 2] : vector<1x8x128xf32> to vector<1xf32>
      %97 = vector.shape_cast %96 : vector<1xf32> to vector<1x1x1xf32>
      %98 = vector.extract %97[0, 0, 0] : f32 from vector<1x1x1xf32>
      %cst_45 = arith.constant 2.000000e+00 : f32
      %99 = arith.mulf %cst_45, %91 : f32
      %cst_46 = arith.constant 1.000000e+00 : f32
      %100 = arith.addf %99, %cst_46 : f32
      %cst_47 = arith.constant 1.000000e+00 : f32
      %101 = arith.addf %98, %cst_47 : f32
      %102 = arith.divf %100, %101 : f32
      %103 = arith.addf %77, %102 : f32
      %cst_48 = arith.constant 2.000000e+00 : f32
      %104 = arith.divf %103, %cst_48 : f32
      %cst_49 = arith.constant 1.000000e+00 : f32
      %105 = arith.subf %cst_49, %104 : f32
      %106 = arith.mulf %44, %105 : f32
      %107 = arith.mulf %43, %50 : f32
      %108 = arith.addf %106, %107 : f32
      %c0_50 = arith.constant 0 : index
      %c0_51 = arith.constant 0 : index
      %109 = memref.load %arg4[%c0_50, %c0_51] : memref<1x1xf32, #tpu.memory_space<smem>>
      memref.store %108, %arg4[%c0_50, %c0_51] : memref<1x1xf32, #tpu.memory_space<smem>>
    } else {
    }
    return
  }
  func.func @transform_0(%arg0: i32) -> i32 {
    %c0_i32 = arith.constant 0 : i32
    %c0_i32_0 = arith.constant 0 : i32
    return %c0_i32 : i32
  }
  func.func @transform_1(%arg0: i32) -> (i32, i32) {
    %c0_i32 = arith.constant 0 : i32
    %c0_i32_0 = arith.constant 0 : i32
    return %c0_i32, %arg0 : i32, i32
  }
  func.func @transform_2(%arg0: i32) -> (i32, i32) {
    %c0_i32 = arith.constant 0 : i32
    %c0_i32_0 = arith.constant 0 : i32
    return %c0_i32, %arg0 : i32, i32
  }
  func.func @transform_3(%arg0: i32) -> (i32, i32) {
    %c0_i32 = arith.constant 0 : i32
    %c0_i32_0 = arith.constant 0 : i32
    %c0_i32_1 = arith.constant 0 : i32
    return %c0_i32, %c0_i32_0 : i32, i32
  }
}

</mosaic_0001>

<bundles_post_ra>
// kernel: tpu_custom_call.1
= control target key start
LH: loop header
LB: loop body
LE: loop exit
PB: predicated region body
PF: predicated region fallthrough
CT: control target
= control target key end

     0   :  { %8 = vsyncpa [#allocation7], 0  ;;  %s352_s0 = inlined_call_operand.hbm [shape: f32[2], index: 0, kind: input, shape index: {}]   ;;  %s353_s1 = inlined_call_operand.hbm [shape: f32[8,256], index: 1, kind: input, shape index: {}]   ;;  %s354_s2 = inlined_call_operand.hbm [shape: f32[8,256], index: 2, kind: input, shape index: {}]   ;;  %s355_s3 = inlined_call_operand.hbm [shape: f32[1,1], index: 3, kind: output, shape index: {}]  }
   0x1   :  { %9 = vsyncpa [#allocation6], 0 }
   0x2   :  { %10 = vsyncpa [#allocation11], 0 }
   0x3   :  { %11 = vsyncpa [#allocation8], 0  ;;  %s312_s12 = smov [#allocation5]   ;;  %s313_s15 = smov [#allocation9]  }
   0x4   :  { %19 = dma.hbm_to_smem %s352_s0, 16, %s312_s12, [#allocation7]  }
   0x5   :  { %s26_s16 = sshll.u32 %s313_s15, 4  ;;  %s314_s17 = smov [#allocation10]   ;;  %s27_s16 = int_to_ptr.vmem [resolvable:$true] %s26_s16 }
   0x6   :  { %s36_s18 = sshll.u32 %s314_s17, 4  ;;  %s264_s19 = scalar_lea.vmem %s27_s16, 256  ;;  %s37_s18 = int_to_ptr.vmem [resolvable:$true] %s36_s18 }
   0x7   :  { %p265_p0 = scmp.ne.s32.totalorder %s27_s16, %s264_s19  ;;  %p269_p1 = scmp.lt.s32.totalorder %s27_s16, %s27_s16 }
   0x8   :  { %p270_p2 = scmp.lt.s32.totalorder %s264_s19, %s264_s19 }
   0xa   :  { %p271_p3 = por %p270_p2, %p269_p1 }
   0xc   :  { %p272_p4 = pnand %p271_p3, %p265_p0 }
   0xe   :  { %275 = shalt.err (!%p272_p4)
}
   0xf   :  { %29 = dma.hbm_to_vmem [thread:$0]  %s353_s1, 256, %s27_s16, [#allocation6]  }
  0x10   :  { %s284_s22 = scalar_lea.vmem %s37_s18, 256  ;;  %p289_p6 = scmp.lt.s32.totalorder %s37_s18, %s37_s18 }
  0x11   :  { %p285_p5 = scmp.ne.s32.totalorder %s37_s18, %s284_s22  ;;  %p290_p7 = scmp.lt.s32.totalorder %s284_s22, %s284_s22 }
  0x13   :  { %p291_p8 = por %p290_p7, %p289_p6 }
  0x15   :  { %p292_p9 = pnand %p291_p8, %p285_p5 }
  0x17   :  { %295 = shalt.err (!%p292_p9)
}
  0x18   :  { %39 = dma.hbm_to_vmem [thread:$0]  %s354_s2, 256, %s37_s18, [#allocation11]  }
  0x19   :  { %304 = dma.done.wait [#allocation7], 16  }
  0x1a   :  { %305 = vsyncadd [#allocation7], 4294967280 }
  0x1b   :  { %306 = dma.done.wait [#allocation6], 256  }
  0x1c   :  { %307 = vsyncadd [#allocation6], 4294967040 }
  0x1d   :  { %308 = dma.done.wait [#allocation11], 256  }
  0x1e   :  { %309 = vsyncadd [#allocation11], 4294967040 }
  0x1f   :  { %49 = sfence }
  0x20   :  { %v57_v0 = vld [vmem:[#allocation9] sm:$0xff]  ;;  %v58_v1 = vld [vmem:[#allocation9 + $0x8] sm:$0xff]  ;;  %v59_v2 = vld [vmem:[#allocation10] sm:$0xff]  ;;  %v119_v3 = vlaneseq  ;;  %v315_v13 = vmov 0.0   ;;  %s104_s8 = sld [smem:[#allocation5]]  ;;  %s316_s19 = smov [#allocation12]  }
  0x21   :  { %v60_v4 = vld [vmem:[#allocation10 + $0x8] sm:$0xff]  ;;  %v96_v5 = vadd.f32 %v59_v2, %v57_v0  ;;  %236 = vlog2.f32 %v57_v0  ;;  %v67_v6 = vsub.f32 1.0, %v57_v0  ;;  %v68_v7 = vsub.f32 1.0, %v58_v1  ;;  %s214_s11 = sld [smem:[#allocation5 + $0x1]] }
  0x22   :  { %v97_v8 = vadd.f32 %v60_v4, %v58_v1  ;;  %v120_v9 = vshrl.u32 %v119_v3, 7  ;;  %238 = vlog2.f32 %v58_v1  ;;  %v90_v10 = vmul.f32 %v59_v2, %v57_v0 }
  0x23   :  { %240 = vlog2.f32 %v67_v6  ;;  %v91_v11 = vmul.f32 %v60_v4, %v58_v1  ;;  %v77_v27 = vsub.f32 1.0, %v59_v2  ;;  %v78_v30 = vsub.f32 1.0, %v60_v4 }
  0x24   :  { %v98_v12 = vadd.f32 %v97_v8, %v96_v5  ;;  %vm122_vm0 = vcmp.lt.s32.totalorder %v120_v9, 4  ;;  %242 = vlog2.f32 %v68_v7  ;;  %vm156_vm1 = vcmp.ge.s32.totalorder %v120_v9, 4 }
  0x25   :  { %v215_v14 = vsel %vm122_vm0, 1.0, %v315_v13  ;;  %v216_v15 = vsel %vm156_vm1, 1.0, %v315_v13  ;;  %v92_v17 = vadd.f32 %v91_v11, %v90_v10 }
  0x26   :  { %v138_v16 = vmul.f32 %v215_v14, %v98_v12  ;;  %v171_v43 = vmul.f32 %v216_v15, %v98_v12 }
  0x27   :  { %v161_v18 = vmul.f32 %v216_v15, %v92_v17  ;;  %v127_v42 = vmul.f32 %v215_v14, %v92_v17 }
  0x28   :  { %139 = vadd.xlane.f32.xlu1 %v138_v16 }
  0x2c   :  { %162 = vadd.xlane.f32.xlu1 %v161_v18 }
  0x2e   :  { %v237_v19 = vpop.eup %236 }
  0x2f   :  { %v239_v20 = vpop.eup %238  ;;  %v62_v21 = vmul.f32 0.6931472, %v237_v19 }
  0x30   :  { %v241_v22 = vpop.eup %240  ;;  %v64_v23 = vmul.f32 0.6931472, %v239_v20 }
  0x31   :  { %v243_v24 = vpop.eup %242  ;;  %v65_v25 = vmax.f32 %v62_v21, -100.0  ;;  %v70_v26 = vmul.f32 0.6931472, %v241_v22 }
  0x32   :  { %v66_v28 = vmax.f32 %v64_v23, -100.0  ;;  %v72_v29 = vmul.f32 0.6931472, %v243_v24 }
  0x33   :  { %v73_v31 = vmax.f32 %v70_v26, -100.0  ;;  %v75_v32 = vmul.f32 %v65_v25, %v59_v2 }
  0x34   :  { %v74_v33 = vmax.f32 %v72_v29, -100.0  ;;  %v76_v34 = vmul.f32 %v66_v28, %v60_v4 }
  0x35   :  { %v79_v35 = vmul.f32 %v77_v27, %v73_v31 }
  0x36   :  { %v80_v36 = vmul.f32 %v78_v30, %v74_v33 }
  0x37   :  { %v81_v37 = vadd.f32 %v79_v35, %v75_v32 }
  0x38   :  { %v82_v38 = vadd.f32 %v80_v36, %v76_v34 }
  0x39   :  { %v83_v39 = vsub.f32 0.0, %v81_v37 }
  0x3a   :  { %v84_v40 = vsub.f32 0.0, %v82_v38 }
  0x3c   :  { %v86_v41 = vadd.f32 %v84_v40, %v83_v39 }
  0x3e   :  { %107 = vadd.xlane.f32.xlu0 %v86_v41 }
  0x42   :  { %128 = vadd.xlane.f32.xlu0 %v127_v42 }
  0x46   :  { %172 = vadd.xlane.f32.xlu0 %v171_v43 }
  0xb1   :  { %v140_v44 = vpop.xlane.xlu1 %139 }
  0xb2   :  { %v141_v45 = vrot.slane %v140_v44, 4 }
  0xb4   :  { %v142_v46 = vadd.f32 %v141_v45, %v140_v44 }
  0xb5   :  { %v163_v1 = vpop.xlane.xlu1 %162 }
  0xb6   :  { %v143_v50 = vrot.slane %v142_v46, 2  ;;  %v164_v3 = vrot.slane %v163_v1, 4 }
  0xb8   :  { %v144_v56 = vadd.f32 %v143_v50, %v142_v46  ;;  %v165_v5 = vadd.f32 %v164_v3, %v163_v1 }
  0xba   :  { %v145_v61 = vrot.slane %v144_v56, 1  ;;  %v166_v8 = vrot.slane %v165_v5, 2 }
  0xbc   :  { %v146_v0 = vadd.f32 %v145_v61, %v144_v56  ;;  %v167_v10 = vadd.f32 %v166_v8, %v165_v5 }
  0xbe   :  { %v168_v12 = vrot.slane %v167_v10, 1 }
  0xc0   :  { %v169_v15 = vadd.f32 %v168_v12, %v167_v10 }
  0xc7   :  { %v108_v47 = vpop.xlane.xlu0 %107 }
  0xc8   :  { %v109_v48 = vrot.slane %v108_v47, 4 }
  0xca   :  { %v110_v49 = vadd.f32 %v109_v48, %v108_v47 }
  0xcb   :  { %v129_v51 = vpop.xlane.xlu0 %128 }
  0xcc   :  { %v111_v52 = vrot.slane %v110_v49, 2  ;;  %v130_v53 = vrot.slane %v129_v51, 4 }
  0xce   :  { %v131_v54 = vadd.f32 %v130_v53, %v129_v51  ;;  %v112_v55 = vadd.f32 %v111_v52, %v110_v49 }
  0xcf   :  { %v173_v2 = vpop.xlane.xlu0 %172 }
  0xd0   :  { %v132_v57 = vrot.slane %v131_v54, 2  ;;  %v113_v58 = vrot.slane %v112_v55, 1  ;;  %v174_v4 = vrot.slane %v173_v2, 4 }
  0xd2   :  { %v114_v59 = vadd.f32 %v113_v58, %v112_v55  ;;  %v133_v60 = vadd.f32 %v132_v57, %v131_v54  ;;  %v175_v6 = vadd.f32 %v174_v4, %v173_v2 }
  0xd4   :  { %217 = vpush %v114_v59  ;;  %v134_v62 = vrot.slane %v133_v60, 1  ;;  %v176_v9 = vrot.slane %v175_v6, 2 }
  0xd6   :  { %v135_v63 = vadd.f32 %v134_v62, %v133_v60  ;;  %v177_v11 = vadd.f32 %v176_v9, %v175_v6 }
  0xd8   :  { %219 = vpush %v135_v63  ;;  %v178_v13 = vrot.slane %v177_v11, 1 }
  0xd9   :  { %221 = vpush %v146_v0 }
  0xda   :  { %v179_v16 = vadd.f32 %v178_v13, %v177_v11 }
 0x105   :  { %s346_s1 = spop %217 }
 0x106   :  { %s118_s13 = smul.f32 0.00048828125, %s346_s1 }
 0x108   :  { %s194_s16 = smul.f32 %s118_s13, %s104_s8 }
 0x109   :  { %s220_s2 = spop %219 }
 0x10a   :  { %s222_s24 = spop %221  ;;  %s148_s26 = smul.f32 2.0, %s220_s2 }
 0x10b   :  { %s150_s25 = sadd.f32 1.0, %s222_s24 }
 0x10c   :  { %s149_s27 = sadd.f32 1.0, %s148_s26 }
 0x10d   :  { %v151_v7 = vstv %s150_s25 }
 0x10e   :  { %244 = vrcp.f32 %v151_v7 }
 0x11b   :  { %v245_v14 = vpop.eup %244 }
 0x11c   :  { %223 = vpush %v245_v14 }
 0x11d   :  { %225 = vpush %v169_v15 }
 0x11e   :  { %227 = vpush %v179_v16 }
 0x14d   :  { %s224_s28 = spop %223 }
 0x14e   :  { %s154_s29 = smul.f32 %s224_s28, %s149_s27  ;;  %s226_s30 = spop %225 }
 0x14f   :  { %s228_s4 = spop %227  ;;  %s181_s6 = smul.f32 2.0, %s226_s30 }
 0x150   :  { %s183_s5 = sadd.f32 1.0, %s228_s4 }
 0x151   :  { %s182_s7 = sadd.f32 1.0, %s181_s6 }
 0x152   :  { %v184_v17 = vstv %s183_s5 }
 0x153   :  { %246 = vrcp.f32 %v184_v17 }
 0x160   :  { %v247_v18 = vpop.eup %246 }
 0x161   :  { %229 = vpush %v247_v18 }
 0x192   :  { %s230_s9 = spop %229 }
 0x193   :  { %s187_s10 = smul.f32 %s230_s9, %s182_s7 }
 0x195   :  { %s188_s12 = sadd.f32 %s187_s10, %s154_s29 }
 0x197   :  { %s191_s14 = smul.f32 0.5, %s188_s12 }
 0x199   :  { %s192_s15 = ssub.f32 1.0, %s191_s14 }
 0x19b   :  { %s193_s17 = smul.f32 %s214_s11, %s192_s15 }
 0x19d   :  { %s195_s18 = sadd.f32 %s194_s16, %s193_s17 }
 0x19f   :  { %197 = sst [smem:[#allocation12]] %s195_s18 }
 0x1a0   :  { %205 = dma.smem_to_hbm %s316_s19, 16, %s355_s3, [#allocation8]  }
 0x1a1   :  { %310 = dma.done.wait [#allocation8], 16  }
 0x1a2   :  { %311 = vsyncadd [#allocation8], 4294967280 }
 0x1a3   :  { %209 = sfence }
 0x1a4   :  { %210 = vsyncpa [#allocation6], 1 }
 0x1a5   :  { %211 = vsyncpa [#allocation11], 1 }
 0x1a6   :  { %212 = vsyncpa [#allocation7], 1 }
 0x1a7   :  { %213 = vsyncpa [#allocation8], 1 }

</bundles_post_ra>
